<compile_context>
chip_gen: v6e
topology: v6e:2x2x1
jax: 0.10.0
libtpu: 0.0.40
codegen_flags: <defaults>
</compile_context>

<pallas_src>
import functools

import jax
import jax.numpy as jnp
from jax import lax
from jax.experimental import pallas as pl
from jax.experimental.pallas import tpu as pltpu


def _elr_loss_kernel(logits_ref, lab_ref, loss_ref,
                     *, beta, lambd, n_valid, tile_n):
    # logits_ref: (TILE_N, C) native-dtype logits tile in VMEM
    # lab_ref:    (TILE_N, 1) int32 labels tile in VMEM
    # loss_ref:   (1, 1) f32 output block in VMEM, reused as the accumulator
    i = pl.program_id(0)

    @pl.when(i == 0)
    def _():
        loss_ref[...] = jnp.zeros_like(loss_ref)

    logits = logits_ref[...].astype(jnp.float32)          # (TILE_N, C)
    labels = lab_ref[...]                                 # (TILE_N, 1) int32
    tn, c = logits.shape

    # Mask padded rows (global row id >= true batch size).
    row_ids = i * tile_n + lax.broadcasted_iota(jnp.int32, (tn, 1), 0)
    valid = (row_ids < n_valid).astype(jnp.float32)       # (TILE_N, 1)

    # one-hot(label) from a lane-axis iota.
    class_ids = lax.broadcasted_iota(jnp.int32, (tn, c), 1)
    onehot = (class_ids == labels).astype(jnp.float32)    # (TILE_N, C)

    # Numerically stable softmax / logsumexp.
    m = jnp.max(logits, axis=1, keepdims=True)            # (TILE_N, 1)
    z = logits - m
    e = jnp.exp(z)
    s = jnp.sum(e, axis=1, keepdims=True)                 # (TILE_N, 1)
    lse = m + jnp.log(s)                                  # (TILE_N, 1)
    inv_s = 1.0 / s                                       # narrow per-row divide
    p = e * inv_s                                         # wide multiply
    p = jnp.clip(p, 1e-4, 1.0 - 1e-4)                     # torch.clamp

    # <target, p> without materializing target:
    #   sum_c(target*p) = beta*sum(p) + (1-beta)*sum(p*p)/sum(p)
    psum = jnp.sum(p, axis=1, keepdims=True)              # (TILE_N, 1)
    pp = jnp.sum(p * p, axis=1, keepdims=True)            # (TILE_N, 1)
    tp = beta * psum + (1.0 - beta) * pp / psum           # (TILE_N, 1)

    # Per-row cross entropy + lambd * per-row ELR regularizer.
    ce_rows = lse - jnp.sum(onehot * logits, axis=1, keepdims=True)
    elr_rows = jnp.log(1.0 - tp)
    rows = ce_rows + lambd * elr_rows                      # (TILE_N, 1)

    partial = jnp.sum(rows * valid, axis=0, keepdims=True)  # (1, 1)
    loss_ref[...] += partial

    @pl.when(i == pl.num_programs(0) - 1)
    def _():
        loss_ref[...] = loss_ref[...] * (1.0 / float(n_valid))


def elr_loss(output, label, *, beta=0.3, lambd=3.0, tile_n=None):
    """output: (N, C) logits (any float dtype); label: (N,) int class ids."""
    n, c = output.shape
    itemsize = jnp.dtype(output.dtype).itemsize
    lab2d = label.astype(jnp.int32).reshape(n, 1)

    if tile_n is None:
        # ~4 MiB of logits per tile; with double-buffering the peak footprint
        # stays well under the scoped VMEM limit on every generation
        # (including v7x's smaller 64 MiB physical VMEM).
        budget = 4 * 1024 * 1024
        tile_n = max(8, min(1024, budget // max(1, c * itemsize)))
    # Multiple of 8 sublanes; never larger than the (8-padded) batch.
    tile_n = max(8, (min(tile_n, pl.cdiv(n, 8) * 8) // 8) * 8)

    n_pad = pl.cdiv(n, tile_n) * tile_n
    if n_pad != n:
        output = jnp.pad(output, ((0, n_pad - n), (0, 0)))
        lab2d = jnp.pad(lab2d, ((0, n_pad - n), (0, 0)))
    grid = (n_pad // tile_n,)

    kernel = functools.partial(
        _elr_loss_kernel,
        beta=float(beta), lambd=float(lambd), n_valid=n, tile_n=tile_n)

    cost = pl.CostEstimate(
        flops=10 * n_pad * c,
        transcendentals=n_pad * c + 3 * n_pad,
        bytes_accessed=n_pad * c * itemsize + n_pad * 4 + 4,
    )

    loss = pl.pallas_call(
        kernel,
        out_shape=jax.ShapeDtypeStruct((1, 1), jnp.float32),
        grid=grid,
        in_specs=[
            pl.BlockSpec((tile_n, c), lambda i: (i, 0)),   # logits tile
            pl.BlockSpec((tile_n, 1), lambda i: (i, 0)),   # labels tile
        ],
        out_specs=pl.BlockSpec((1, 1), lambda i: (0, 0)),  # resident accumulator
        compiler_params=pltpu.CompilerParams(
            dimension_semantics=("arbitrary",),   # batch axis is a reduction
            vmem_limit_bytes=32 * 1024 * 1024,
        ),
        cost_estimate=cost,
    )(output, lab2d)
    return loss[0, 0]


def _elr_loss_ref(output, label, *, beta=0.3, lambd=3.0):
    """Pure-JAX reference mirroring the PyTorch forward."""
    output = output.astype(jnp.float32)
    p = jax.nn.softmax(output, axis=1)
    p = jnp.clip(p, 1e-4, 1.0 - 1e-4)
    target = beta + (1.0 - beta) * (p / jnp.sum(p, axis=1, keepdims=True))
    logp = jax.nn.log_softmax(output, axis=1)
    ce = -jnp.mean(jnp.take_along_axis(
        logp, label[:, None].astype(jnp.int32), axis=1))
    elr = jnp.mean(jnp.log(1.0 - jnp.sum(target * p, axis=1)))
    return ce + lambd * elr


if __name__ == "__main__":
    key = jax.random.PRNGKey(0)
    k_logits, k_label = jax.random.split(key)

    # Module default: num_classes=4.
    N, C = 8, 4
    logits = jax.random.normal(k_logits, (N, C), dtype=jnp.float32) * 2.0
    labels = jax.random.randint(k_label, (N,), 0, C, dtype=jnp.int32)

    loss = jax.block_until_ready(elr_loss(logits, labels, beta=0.3, lambd=3.0))
    ref = _elr_loss_ref(logits, labels, beta=0.3, lambd=3.0)
    assert jnp.allclose(loss, ref, rtol=1e-5, atol=1e-5), (loss, ref)

    # Exercise the padded/masked path (batch not a multiple of the 8-row tile).
    N2 = 6
    logits2 = jax.random.normal(k_logits, (N2, C), dtype=jnp.float32) * 2.0
    labels2 = jax.random.randint(k_label, (N2,), 0, C, dtype=jnp.int32)
    loss2 = jax.block_until_ready(elr_loss(logits2, labels2, beta=0.3, lambd=3.0))
    ref2 = _elr_loss_ref(logits2, labels2, beta=0.3, lambd=3.0)
    assert jnp.allclose(loss2, ref2, rtol=1e-5, atol=1e-5), (loss2, ref2)

    print("KERNEL_OK")
</pallas_src>

<mosaic_0001>
module attributes {stable_mosaic.version = 11 : i64} {
  func.func @_elr_loss_kernel(%arg0: i32, %arg1: memref<8x4xf32, #tpu.memory_space<vmem>>, %arg2: memref<8x1xi32, #tpu.memory_space<vmem>>, %arg3: memref<1x1xf32, #tpu.memory_space<vmem>>) attributes {dimension_semantics = [#tpu.dimension_semantics<arbitrary>], iteration_bounds = array<i64: 1>, scalar_prefetch = 0 : i64, scratch_operands = 0 : i64, tpu.core_type = #tpu.core_type<tc>, window_params = [{transform_indices = @transform_0, window_bounds = array<i64: 8, 4>}, {transform_indices = @transform_1, window_bounds = array<i64: 8, 1>}, {pipeline_mode = #tpu.pipeline_mode<synchronous>, transform_indices = @transform_2, window_bounds = array<i64: 1, 1>}]} {
    %c0_i32 = arith.constant 0 : i32
    %0 = arith.cmpi eq, %arg0, %c0_i32 : i32
    %1 = arith.extui %0 : i1 to i32
    %c0_i32_0 = arith.constant 0 : i32
    %2 = arith.cmpi ne, %1, %c0_i32_0 : i32
    scf.if %2 {
      %cst_23 = arith.constant 0.000000e+00 : f32
      %65 = vector.broadcast %cst_23 : f32 to vector<1x1xf32>
      %c0_24 = arith.constant 0 : index
      %c0_25 = arith.constant 0 : index
      %66 = vector.load %arg3[%c0_24, %c0_25] : memref<1x1xf32, #tpu.memory_space<vmem>>, vector<1x1xf32>
      tpu.vector_store %arg3[%c0_24, %c0_25], %65 {strides = array<i32>} : memref<1x1xf32, #tpu.memory_space<vmem>>, vector<1x1xf32>,
    } else {
    }
    %c0 = arith.constant 0 : index
    %c0_1 = arith.constant 0 : index
    %3 = vector.load %arg1[%c0, %c0_1] : memref<8x4xf32, #tpu.memory_space<vmem>>, vector<8x4xf32>
    %c0_2 = arith.constant 0 : index
    %c0_3 = arith.constant 0 : index
    %4 = vector.load %arg2[%c0_2, %c0_3] : memref<8x1xi32, #tpu.memory_space<vmem>>, vector<8x1xi32>
    %c8_i32 = arith.constant 8 : i32
    %5 = arith.muli %arg0, %c8_i32 : i32
    %6 = tpu.iota {dimensions = array<i32: 0>} : vector<8x1xi32>
    %7 = vector.broadcast %5 : i32 to vector<8x1xi32>
    %8 = arith.addi %7, %6 : vector<8x1xi32>
    %c8_i32_4 = arith.constant 8 : i32
    %9 = vector.broadcast %c8_i32_4 : i32 to vector<8x1xi32>
    %10 = arith.cmpi slt, %8, %9 : vector<8x1xi32>
    %11 = arith.extui %10 : vector<8x1xi1> to vector<8x1xi32>
    %12 = arith.sitofp %11 : vector<8x1xi32> to vector<8x1xf32>
    %13 = tpu.iota {dimensions = array<i32: 1>} : vector<8x4xi32>
    %14 = vector.broadcast %4 : vector<8x1xi32> to vector<8x4xi32>
    %15 = arith.cmpi eq, %13, %14 : vector<8x4xi32>
    %16 = arith.extui %15 : vector<8x4xi1> to vector<8x4xi32>
    %17 = arith.sitofp %16 : vector<8x4xi32> to vector<8x4xf32>
    %cst = arith.constant dense<0xFF800000> : vector<8xf32>
    %18 = vector.multi_reduction <maximumf>, %3, %cst [1] : vector<8x4xf32> to vector<8xf32>
    %19 = vector.shape_cast %18 : vector<8xf32> to vector<8x1xf32>
    %20 = vector.broadcast %19 : vector<8x1xf32> to vector<8x4xf32>
    %21 = arith.subf %3, %20 : vector<8x4xf32>
    %22 = math.exp %21 : vector<8x4xf32>
    %cst_5 = arith.constant dense<0.000000e+00> : vector<8xf32>
    %23 = vector.multi_reduction <add>, %22, %cst_5 [1] : vector<8x4xf32> to vector<8xf32>
    %24 = vector.shape_cast %23 : vector<8xf32> to vector<8x1xf32>
    %25 = math.log %24 : vector<8x1xf32>
    %26 = arith.addf %19, %25 : vector<8x1xf32>
    %cst_6 = arith.constant 1.000000e+00 : f32
    %27 = vector.broadcast %cst_6 : f32 to vector<8x1xf32>
    %28 = arith.divf %27, %24 : vector<8x1xf32>
    %29 = vector.broadcast %28 : vector<8x1xf32> to vector<8x4xf32>
    %30 = arith.mulf %22, %29 : vector<8x4xf32>
    %cst_7 = arith.constant 9.99999974E-5 : f32
    %cst_8 = arith.constant 0.999899983 : f32
    %31 = vector.broadcast %cst_7 : f32 to vector<8x4xf32>
    %32 = arith.maximumf %31, %30 : vector<8x4xf32>
    %33 = vector.broadcast %cst_8 : f32 to vector<8x4xf32>
    %34 = arith.minimumf %33, %32 : vector<8x4xf32>
    %cst_9 = arith.constant dense<0.000000e+00> : vector<8xf32>
    %35 = vector.multi_reduction <add>, %34, %cst_9 [1] : vector<8x4xf32> to vector<8xf32>
    %36 = vector.shape_cast %35 : vector<8xf32> to vector<8x1xf32>
    %37 = arith.mulf %34, %34 : vector<8x4xf32>
    %cst_10 = arith.constant dense<0.000000e+00> : vector<8xf32>
    %38 = vector.multi_reduction <add>, %37, %cst_10 [1] : vector<8x4xf32> to vector<8xf32>
    %39 = vector.shape_cast %38 : vector<8xf32> to vector<8x1xf32>
    %cst_11 = arith.constant 3.000000e-01 : f32
    %40 = vector.broadcast %cst_11 : f32 to vector<8x1xf32>
    %41 = arith.mulf %40, %36 : vector<8x1xf32>
    %cst_12 = arith.constant 0.699999988 : f32
    %42 = vector.broadcast %cst_12 : f32 to vector<8x1xf32>
    %43 = arith.mulf %42, %39 : vector<8x1xf32>
    %44 = arith.divf %43, %36 : vector<8x1xf32>
    %45 = arith.addf %41, %44 : vector<8x1xf32>
    %46 = arith.mulf %17, %3 : vector<8x4xf32>
    %cst_13 = arith.constant dense<0.000000e+00> : vector<8xf32>
    %47 = vector.multi_reduction <add>, %46, %cst_13 [1] : vector<8x4xf32> to vector<8xf32>
    %48 = vector.shape_cast %47 : vector<8xf32> to vector<8x1xf32>
    %49 = arith.subf %26, %48 : vector<8x1xf32>
    %cst_14 = arith.constant 1.000000e+00 : f32
    %50 = vector.broadcast %cst_14 : f32 to vector<8x1xf32>
    %51 = arith.subf %50, %45 : vector<8x1xf32>
    %52 = math.log %51 : vector<8x1xf32>
    %cst_15 = arith.constant 3.000000e+00 : f32
    %53 = vector.broadcast %cst_15 : f32 to vector<8x1xf32>
    %54 = arith.mulf %53, %52 : vector<8x1xf32>
    %55 = arith.addf %49, %54 : vector<8x1xf32>
    %56 = arith.mulf %55, %12 : vector<8x1xf32>
    %cst_16 = arith.constant dense<0.000000e+00> : vector<1xf32>
    %57 = vector.multi_reduction <add>, %56, %cst_16 [0] : vector<8x1xf32> to vector<1xf32>
    %58 = vector.shape_cast %57 : vector<1xf32> to vector<1x1xf32>
    %c0_17 = arith.constant 0 : index
    %c0_18 = arith.constant 0 : index
    %59 = vector.load %arg3[%c0_17, %c0_18] : memref<1x1xf32, #tpu.memory_space<vmem>>, vector<1x1xf32>
    %60 = arith.addf %59, %58 : vector<1x1xf32>
    %c0_19 = arith.constant 0 : index
    %c0_20 = arith.constant 0 : index
    %61 = vector.load %arg3[%c0_19, %c0_20] : memref<1x1xf32, #tpu.memory_space<vmem>>, vector<1x1xf32>
    tpu.vector_store %arg3[%c0_19, %c0_20], %60 {strides = array<i32>} : memref<1x1xf32, #tpu.memory_space<vmem>>, vector<1x1xf32>,
    %c0_i32_21 = arith.constant 0 : i32
    %62 = arith.cmpi eq, %arg0, %c0_i32_21 : i32
    %63 = arith.extui %62 : i1 to i32
    %c0_i32_22 = arith.constant 0 : i32
    %64 = arith.cmpi ne, %63, %c0_i32_22 : i32
    scf.if %64 {
      %c0_23 = arith.constant 0 : index
      %c0_24 = arith.constant 0 : index
      %65 = vector.load %arg3[%c0_23, %c0_24] : memref<1x1xf32, #tpu.memory_space<vmem>>, vector<1x1xf32>
      %cst_25 = arith.constant 1.250000e-01 : f32
      %66 = vector.broadcast %cst_25 : f32 to vector<1x1xf32>
      %67 = arith.mulf %65, %66 : vector<1x1xf32>
      %c0_26 = arith.constant 0 : index
      %c0_27 = arith.constant 0 : index
      %68 = vector.load %arg3[%c0_26, %c0_27] : memref<1x1xf32, #tpu.memory_space<vmem>>, vector<1x1xf32>
      tpu.vector_store %arg3[%c0_26, %c0_27], %67 {strides = array<i32>} : memref<1x1xf32, #tpu.memory_space<vmem>>, vector<1x1xf32>,
    } else {
    }
    return
  }
  func.func @transform_0(%arg0: i32) -> (i32, i32) {
    %c0_i32 = arith.constant 0 : i32
    %c0_i32_0 = arith.constant 0 : i32
    return %arg0, %c0_i32 : i32, i32
  }
  func.func @transform_1(%arg0: i32) -> (i32, i32) {
    %c0_i32 = arith.constant 0 : i32
    %c0_i32_0 = arith.constant 0 : i32
    return %arg0, %c0_i32 : i32, i32
  }
  func.func @transform_2(%arg0: i32) -> (i32, i32) {
    %c0_i32 = arith.constant 0 : i32
    %c0_i32_0 = arith.constant 0 : i32
    %c0_i32_1 = arith.constant 0 : i32
    return %c0_i32, %c0_i32_0 : i32, i32
  }
}

</mosaic_0001>

<bundles_post_ra>
// kernel: tpu_custom_call.1
= control target key start
LH: loop header
LB: loop body
LE: loop exit
PB: predicated region body
PF: predicated region fallthrough
CT: control target
= control target key end

     0   :  { %vm36_vm0 = vcmask 31744   ;;  %s180_s0 = inlined_call_operand.vmem [shape: f32[8,4], index: 0, kind: input, shape index: {}]   ;;  %s181_s1 = inlined_call_operand.vmem [shape: s32[8,1], index: 1, kind: input, shape index: {}]   ;;  %s182_s2 = inlined_call_operand.hbm [shape: f32[1,1], index: 2, kind: output, shape index: {}]  }
   0x1   :  { %v18_v0 = vld [vmem:[%s180_s0] sm:$0xff] }
   0x2   :  { %7 = vsyncpa [#allocation3], 0  ;;  %v37_v1 = vsel %vm36_vm0, %v18_v0, -inf  ;;  %v19_v2 = vld [vmem:[%s181_s1] sm:$0xff]  ;;  %v145_v3 = vmov 0   ;;  %vm16_vm1 = vcmask 0   ;;  %v28_v11 = vlaneseq }
   0x3   :  { %38 = vmax.xlane.f32.xlu0 %v37_v1  ;;  %111 = vset.pattern.permute.xlu1 %v145_v3  ;;  %v146_v9 = vmov 0.0   ;;  %s147_s0 = smov [#allocation2]  }
   0x4   :  { %112 = vset.pattern.permute.xlu0 %v145_v3  ;;  %31 = vperm.xlu1 %111, %v19_v2   ;;  %17 = vst.msk [vmem:[#allocation2] sm:$0x1] %vm16_vm1, %v146_v9  ;;  %v29_v12 = vand.u32 127, %v28_v11  ;;  %s99_s1 = sshll.u32 %s147_s0, 4  ;;  %s100_s1 = int_to_ptr.vmem [resolvable:$true] %s99_s1 }
   0x5   :  { %s123_s13 = scalar_lea.vmem %s100_s1, 16  ;;  %s127_s14 = scalar_lea.vmem %s100_s1, 32 }
   0x6   :  { %p124_p0 = scmp.ne.s32.totalorder %s100_s1, %s123_s13  ;;  %p128_p1 = scmp.lt.s32.totalorder %s100_s1, %s100_s1 }
   0x7   :  { %p129_p2 = scmp.lt.s32.totalorder %s127_s14, %s123_s13 }
   0x9   :  { %p130_p3 = por %p129_p2, %p128_p1 }
   0xb   :  { %v83_v46 = vld [vmem:[#allocation2] sm:$0x1]  ;;  %p131_p4 = pnand %p130_p3, %p124_p0 }
  0x7f   :  { %v32_v13 = vpop.permute.xlu1 %31 }
  0x80   :  { %vm33_vm2 = vcmp.eq.s32.totalorder %v29_v12, %v32_v13 }
  0x81   :  { %v107_v17 = vsel %vm33_vm2, 1.0, %v146_v9 }
  0x82   :  { %v66_v21 = vmul.f32 %v107_v17, %v18_v0 }
  0x84   :  { %v67_v23 = vsel %vm36_vm0, %v66_v21, 0.0 }
  0x8c   :  { %v39_v4 = vpop.xlane.xlu0 %38 }
  0x8d   :  { %v40_v5 = vsub.f32 %v18_v0, %v39_v4 }
  0x8f   :  { %v41_v6 = vmul.f32 1.442695, %v40_v5 }
  0x91   :  { %113 = vpow2.f32 %v41_v6 }
  0x9e   :  { %v114_v7 = vpop.eup %113 }
  0x9f   :  { %v43_v8 = vsel %vm36_vm0, %v114_v7, 0.0 }
  0xa0   :  { %44 = vadd.xlane.f32.xlu0 %v43_v8 }
 0x129   :  { %v45_v10 = vpop.xlane.xlu0 %44 }
 0x12a   :  { %115 = vrcp.f32 %v45_v10 }
 0x137   :  { %v116_v14 = vpop.eup %115 }
 0x138   :  { %v51_v15 = vmul.f32 %v116_v14, %v114_v7 }
 0x13a   :  { %v52_v16 = vmax.f32 %v51_v15, 0.0001 }
 0x13c   :  { %v53_v18 = vmin.f32 %v52_v16, 0.9999 }
 0x13e   :  { %v54_v19 = vsel %vm36_vm0, %v53_v18, 0.0  ;;  %v57_v20 = vmul.f32 %v53_v18, %v53_v18 }
 0x13f   :  { %55 = vadd.xlane.f32.xlu1 %v54_v19 }
 0x140   :  { %v58_v22 = vsel %vm36_vm0, %v57_v20, 0.0 }
 0x141   :  { %59 = vadd.xlane.f32.xlu0 %v58_v22 }
 0x145   :  { %68 = vadd.xlane.f32.xlu0 %v67_v23 }
 0x1c8   :  { %v56_v24 = vpop.xlane.xlu1 %55 }
 0x1c9   :  { %117 = vrcp.f32 %v56_v24  ;;  %v61_v28 = vmul.f32 0.3, %v56_v24 }
 0x1ca   :  { %v60_v25 = vpop.xlane.xlu0 %59  ;;  %119 = vlog2.f32 %v45_v10 }
 0x1cb   :  { %v62_v26 = vmul.f32 0.7, %v60_v25 }
 0x1ce   :  { %v69_v35 = vpop.xlane.xlu0 %68 }
 0x1d6   :  { %v118_v27 = vpop.eup %117 }
 0x1d7   :  { %v64_v29 = vmul.f32 %v118_v27, %v62_v26  ;;  %v120_v32 = vpop.eup %119 }
 0x1d8   :  { %v47_v33 = vmul.f32 0.6931472, %v120_v32 }
 0x1d9   :  { %v65_v30 = vadd.f32 %v64_v29, %v61_v28 }
 0x1da   :  { %v48_v36 = vadd.f32 %v47_v33, %v39_v4 }
 0x1db   :  { %v71_v31 = vsub.f32 1.0, %v65_v30 }
 0x1dc   :  { %v70_v39 = vsub.f32 %v48_v36, %v69_v35 }
 0x1dd   :  { %121 = vlog2.f32 %v71_v31 }
 0x1ea   :  { %v122_v34 = vpop.eup %121 }
 0x1eb   :  { %v73_v37 = vmul.f32 0.6931472, %v122_v34 }
 0x1ed   :  { %v74_v38 = vmul.f32 3.0, %v73_v37 }
 0x1ef   :  { %v75_v40 = vadd.f32 %v74_v38, %v70_v39 }
 0x1f1   :  { %v77_v41 = vrot.slane %v75_v40, 4 }
 0x1f3   :  { %v78_v42 = vadd.f32 %v77_v41, %v75_v40 }
 0x1f5   :  { %v79_v43 = vrot.slane %v78_v42, 2 }
 0x1f7   :  { %v80_v44 = vadd.f32 %v79_v43, %v78_v42 }
 0x1f9   :  { %v81_v45 = vrot.slane %v80_v44, 1 }
 0x1fb   :  { %v82_v47 = vadd.f32 %v81_v45, %v80_v44 }
 0x1fd   :  { %v84_v48 = vadd.f32 %v83_v46, %v82_v47 }
 0x1ff   :  { %86 = vst.msk [vmem:[#allocation2] sm:$0x1] %vm16_vm1, %v84_v48 }
 0x206   :  { %v90_v49 = vld [vmem:[#allocation2] sm:$0x1] }
 0x207   :  { %v91_v50 = vmul.f32 0.125, %v90_v49 }
 0x209   :  { %92 = vst.msk [vmem:[#allocation2] sm:$0x1] %vm16_vm1, %v91_v50 }
 0x20a   :  { %134 = shalt.err (!%p131_p4)
}
 0x20b   :  { %102 = dma.vmem_to_hbm [thread:$0]  %s100_s1, 16, %s182_s2, [#allocation3]  }
 0x20c   :  { %143 = dma.done.wait [#allocation3], 16  }
 0x20d   :  { %144 = vsyncadd [#allocation3], 4294967280 }
 0x20e   :  { %106 = vsyncpa [#allocation3], 1 }

</bundles_post_ra>
